<compile_context>
chip_gen: v5e
topology: v5e:2x2
jax: 0.10.0
libtpu: 0.0.40
codegen_flags: <defaults>
</compile_context>

<pallas_src>
import functools

import jax
import jax.numpy as jnp
from jax.experimental import pallas as pl
from jax.experimental.pallas import tpu as pltpu


def _lsr_kernel(x_ref, lbl_ref, out_ref, *, smooth_val, confidence, coef_lse,
                tile_n, n_valid):
    """One (TILE_N, K) row-tile -> one scalar partial loss (broadcast to 8x128)."""
    i = pl.program_id(0)

    x = x_ref[...].astype(jnp.float32)          # (tile_n, K) logits, f32 in-register
    lbl = lbl_ref[...]                          # (tile_n, 1) int32 labels

    # Stable log-softmax pieces (log_probs itself is never materialized).
    m = jnp.max(x, axis=-1, keepdims=True)                       # (tile_n, 1)
    z = x - m                                                    # (tile_n, K)
    lse = jnp.log(jnp.sum(jnp.exp(z), axis=-1, keepdims=True))   # (tile_n, 1)
    sum_z = jnp.sum(z, axis=-1, keepdims=True)                   # (tile_n, 1)

    # z at the label column via iota==label select (replaces the Python scatter).
    col = jax.lax.broadcasted_iota(jnp.int32, z.shape, 1)
    z_lbl = jnp.sum(jnp.where(col == lbl, z, 0.0), axis=-1, keepdims=True)

    # loss_i = -(smooth_val*(sum_z - K*lse) + confidence*(z_lbl - lse))
    row_loss = coef_lse * lse - smooth_val * sum_z - confidence * z_lbl

    # Mask rows that are padding (batch not a multiple of tile_n).
    row = i * tile_n + jax.lax.broadcasted_iota(jnp.int32, (tile_n, 1), 0)
    row_loss = jnp.where(row < n_valid, row_loss, 0.0)

    total = jnp.sum(row_loss, axis=0, keepdims=True)             # (1, 1)
    # Lane-dense, fully aligned (8, 128) store of the tile partial.
    out_ref[...] = jnp.broadcast_to(total, out_ref.shape)


def cross_entropy_lsr(pre, label, para_LSR=0.2, size_average=True, tile_n=None):
    """Pallas wrapper: pre (N, K) float logits, label (N,) int -> scalar loss."""
    n, k = pre.shape
    in_itemsize = jnp.dtype(pre.dtype).itemsize
    labels2d = label.reshape(n, 1).astype(jnp.int32)

    # Sublane alignment for the input dtype (f32: 8, bf16: 16, int8/fp8: 32).
    sub = max(8, 32 // in_itemsize)

    # Pick a row tile whose double-buffered input + f32 working set fits the
    # smallest default scoped-VMEM budget (v5e: 16 MiB); cap at 512 rows.
    if tile_n is None:
        budget = 12 * 1024 * 1024
        per_row = k * (2 * in_itemsize + 8)     # 2x input buffers + ~2 f32 temps
        tile_n = min(512, max(sub, budget // per_row))
    tile_n = max(sub, (int(tile_n) // sub) * sub)
    n_align = ((n + sub - 1) // sub) * sub
    tile_n = min(tile_n, n_align)

    g = -(-n // tile_n)                          # number of row tiles
    n_pad = g * tile_n
    if n_pad != n:
        x = jnp.pad(pre, ((0, n_pad - n), (0, 0)))
        lbl = jnp.pad(labels2d, ((0, n_pad - n), (0, 0)))
    else:
        x, lbl = pre, labels2d

    smooth_val = float(para_LSR) / float(k)
    confidence = 1.0 - float(para_LSR)
    coef_lse = smooth_val * k + confidence       # == 1.0 (kept general)

    kernel = functools.partial(
        _lsr_kernel,
        smooth_val=smooth_val,
        confidence=confidence,
        coef_lse=coef_lse,
        tile_n=tile_n,
        n_valid=n,
    )

    partials = pl.pallas_call(
        kernel,
        out_shape=jax.ShapeDtypeStruct((g, 8, 128), jnp.float32),
        grid_spec=pltpu.PrefetchScalarGridSpec(
            num_scalar_prefetch=0,
            grid=(g,),
            in_specs=[
                pl.BlockSpec((tile_n, k), lambda i: (i, 0)),   # logits tile
                pl.BlockSpec((tile_n, 1), lambda i: (i, 0)),   # labels tile
            ],
            out_specs=pl.BlockSpec((None, 8, 128), lambda i: (i, 0, 0)),
        ),
        compiler_params=pltpu.CompilerParams(
            dimension_semantics=("parallel",),      # shards tiles across TCs (v7x)
            vmem_limit_bytes=32 * 1024 * 1024,
        ),
        cost_estimate=pl.CostEstimate(
            flops=int(8 * n_pad * k),
            transcendentals=int(n_pad * k + n_pad),
            bytes_accessed=int(n_pad * k * in_itemsize + n_pad * 4 + g * 8 * 128 * 4),
        ),
    )(x, lbl)

    total = jnp.sum(partials[:, 0, 0])
    if size_average:
        return total / jnp.float32(n)
    return total


def _reference_loss(pre, label, para_LSR, size_average=True):
    """Pure-JAX mirror of the PyTorch forward."""
    pre = pre.astype(jnp.float32)
    n, k = pre.shape
    prob = para_LSR / k
    one_hot = jnp.full((n, k), prob, dtype=jnp.float32)
    one_hot = one_hot.at[jnp.arange(n), label].add(1.0 - para_LSR)
    scores = jax.nn.log_softmax(pre, axis=-1)
    loss = jnp.sum(-one_hot * scores, axis=1)
    return jnp.mean(loss) if size_average else jnp.sum(loss)


if __name__ == "__main__":
    key = jax.random.PRNGKey(0)
    k_logits, k_labels = jax.random.split(key)

    N, K = 20, 384   # batch 20 (not a multiple of 8 -> exercises row masking)
    pre = jax.random.normal(k_logits, (N, K), dtype=jnp.float32) * 3.0
    labels = jax.random.randint(k_labels, (N,), 0, K, dtype=jnp.int32)

    # 1) label smoothing, mean reduction, forced tile_n=8 -> 3-step grid + masked tail.
    out = jax.block_until_ready(
        cross_entropy_lsr(pre, labels, para_LSR=0.2, size_average=True, tile_n=8))
    ref = _reference_loss(pre, labels, 0.2, True)
    assert jnp.allclose(out, ref, rtol=1e-4, atol=1e-5), (out, ref)

    # 2) sum reduction.
    out_sum = jax.block_until_ready(
        cross_entropy_lsr(pre, labels, para_LSR=0.2, size_average=False, tile_n=8))
    ref_sum = _reference_loss(pre, labels, 0.2, False)
    assert jnp.allclose(out_sum, ref_sum, rtol=1e-4, atol=1e-4), (out_sum, ref_sum)

    # 3) para_LSR = 0 -> plain cross entropy; auto tile selection (single tile).
    out0 = jax.block_until_ready(
        cross_entropy_lsr(pre, labels, para_LSR=0.0, size_average=True))
    ref0 = _reference_loss(pre, labels, 0.0, True)
    assert jnp.allclose(out0, ref0, rtol=1e-4, atol=1e-5), (out0, ref0)

    # 4) bf16 logits (kernel upcasts in-register; halves HBM traffic at scale).
    pre_bf16 = pre.astype(jnp.bfloat16)
    out_bf = jax.block_until_ready(
        cross_entropy_lsr(pre_bf16, labels, para_LSR=0.2, size_average=True, tile_n=8))
    ref_bf = _reference_loss(pre_bf16.astype(jnp.float32), labels, 0.2, True)
    assert jnp.allclose(out_bf, ref_bf, rtol=1e-3, atol=1e-3), (out_bf, ref_bf)

    print("KERNEL_OK")
</pallas_src>

<mosaic_0001>
module attributes {stable_mosaic.version = 11 : i64} {
  func.func @_lsr_kernel(%arg0: i32, %arg1: memref<8x384xf32, #tpu.memory_space<vmem>>, %arg2: memref<8x1xi32, #tpu.memory_space<vmem>>, %arg3: memref<1x8x128xf32, #tpu.memory_space<vmem>>) attributes {dimension_semantics = [#tpu.dimension_semantics<parallel>], iteration_bounds = array<i64: 3>, scalar_prefetch = 0 : i64, scratch_operands = 0 : i64, tpu.core_type = #tpu.core_type<tc>, window_params = [{transform_indices = @transform_0, window_bounds = array<i64: 8, 384>}, {transform_indices = @transform_1, window_bounds = array<i64: 8, 1>}, {transform_indices = @transform_2, window_bounds = array<i64: 1, 8, 128>}]} {
    %c0 = arith.constant 0 : index
    %c0_0 = arith.constant 0 : index
    %0 = vector.load %arg1[%c0, %c0_0] : memref<8x384xf32, #tpu.memory_space<vmem>>, vector<8x384xf32>
    %c0_1 = arith.constant 0 : index
    %c0_2 = arith.constant 0 : index
    %1 = vector.load %arg2[%c0_1, %c0_2] : memref<8x1xi32, #tpu.memory_space<vmem>>, vector<8x1xi32>
    %cst = arith.constant dense<0xFF800000> : vector<8xf32>
    %2 = vector.multi_reduction <maximumf>, %0, %cst [1] : vector<8x384xf32> to vector<8xf32>
    %3 = vector.shape_cast %2 : vector<8xf32> to vector<8x1xf32>
    %4 = vector.broadcast %3 : vector<8x1xf32> to vector<8x384xf32>
    %5 = arith.subf %0, %4 : vector<8x384xf32>
    %6 = math.exp %5 : vector<8x384xf32>
    %cst_3 = arith.constant dense<0.000000e+00> : vector<8xf32>
    %7 = vector.multi_reduction <add>, %6, %cst_3 [1] : vector<8x384xf32> to vector<8xf32>
    %8 = vector.shape_cast %7 : vector<8xf32> to vector<8x1xf32>
    %9 = math.log %8 : vector<8x1xf32>
    %cst_4 = arith.constant dense<0.000000e+00> : vector<8xf32>
    %10 = vector.multi_reduction <add>, %5, %cst_4 [1] : vector<8x384xf32> to vector<8xf32>
    %11 = vector.shape_cast %10 : vector<8xf32> to vector<8x1xf32>
    %12 = tpu.iota {dimensions = array<i32: 1>} : vector<8x384xi32>
    %13 = vector.broadcast %1 : vector<8x1xi32> to vector<8x384xi32>
    %14 = arith.cmpi eq, %12, %13 : vector<8x384xi32>
    %cst_5 = arith.constant 0.000000e+00 : f32
    %15 = vector.broadcast %cst_5 : f32 to vector<8x384xf32>
    %16 = arith.select %14, %5, %15 : vector<8x384xi1>, vector<8x384xf32>
    %cst_6 = arith.constant dense<0.000000e+00> : vector<8xf32>
    %17 = vector.multi_reduction <add>, %16, %cst_6 [1] : vector<8x384xf32> to vector<8xf32>
    %18 = vector.shape_cast %17 : vector<8xf32> to vector<8x1xf32>
    %cst_7 = arith.constant 1.000000e+00 : f32
    %19 = vector.broadcast %cst_7 : f32 to vector<8x1xf32>
    %20 = arith.mulf %19, %9 : vector<8x1xf32>
    %cst_8 = arith.constant 5.2083336E-4 : f32
    %21 = vector.broadcast %cst_8 : f32 to vector<8x1xf32>
    %22 = arith.mulf %21, %11 : vector<8x1xf32>
    %23 = arith.subf %20, %22 : vector<8x1xf32>
    %cst_9 = arith.constant 8.000000e-01 : f32
    %24 = vector.broadcast %cst_9 : f32 to vector<8x1xf32>
    %25 = arith.mulf %24, %18 : vector<8x1xf32>
    %26 = arith.subf %23, %25 : vector<8x1xf32>
    %c8_i32 = arith.constant 8 : i32
    %27 = arith.muli %arg0, %c8_i32 : i32
    %28 = tpu.iota {dimensions = array<i32: 0>} : vector<8x1xi32>
    %29 = vector.broadcast %27 : i32 to vector<8x1xi32>
    %30 = arith.addi %29, %28 : vector<8x1xi32>
    %c20_i32 = arith.constant 20 : i32
    %31 = vector.broadcast %c20_i32 : i32 to vector<8x1xi32>
    %32 = arith.cmpi slt, %30, %31 : vector<8x1xi32>
    %cst_10 = arith.constant 0.000000e+00 : f32
    %33 = vector.broadcast %cst_10 : f32 to vector<8x1xf32>
    %34 = arith.select %32, %26, %33 : vector<8x1xi1>, vector<8x1xf32>
    %cst_11 = arith.constant dense<0.000000e+00> : vector<1xf32>
    %35 = vector.multi_reduction <add>, %34, %cst_11 [0] : vector<8x1xf32> to vector<1xf32>
    %36 = vector.shape_cast %35 : vector<1xf32> to vector<1x1xf32>
    %37 = vector.shape_cast %36 : vector<1x1xf32> to vector<1x1xf32>
    %38 = vector.broadcast %37 : vector<1x1xf32> to vector<8x128xf32>
    %c0_12 = arith.constant 0 : index
    %c0_13 = arith.constant 0 : index
    %c0_14 = arith.constant 0 : index
    %39 = vector.load %arg3[%c0_12, %c0_13, %c0_14] : memref<1x8x128xf32, #tpu.memory_space<vmem>>, vector<1x8x128xf32>
    %40 = vector.shape_cast %39 : vector<1x8x128xf32> to vector<8x128xf32>
    %41 = vector.shape_cast %38 : vector<8x128xf32> to vector<1x8x128xf32>
    tpu.vector_store %arg3[%c0_12, %c0_13, %c0_14], %41 {strides = array<i32>} : memref<1x8x128xf32, #tpu.memory_space<vmem>>, vector<1x8x128xf32>,
    return
  }
  func.func @transform_0(%arg0: i32) -> (i32, i32) {
    %c0_i32 = arith.constant 0 : i32
    %c0_i32_0 = arith.constant 0 : i32
    return %arg0, %c0_i32 : i32, i32
  }
  func.func @transform_1(%arg0: i32) -> (i32, i32) {
    %c0_i32 = arith.constant 0 : i32
    %c0_i32_0 = arith.constant 0 : i32
    return %arg0, %c0_i32 : i32, i32
  }
  func.func @transform_2(%arg0: i32) -> (i32, i32, i32) {
    %c0_i32 = arith.constant 0 : i32
    %c0_i32_0 = arith.constant 0 : i32
    %c0_i32_1 = arith.constant 0 : i32
    return %arg0, %c0_i32, %c0_i32_0 : i32, i32, i32
  }
}

</mosaic_0001>

<bundles_post_ra>
// kernel: tpu_custom_call.1
= control target key start
LH: loop header
LB: loop body
LE: loop exit
PB: predicated region body
PF: predicated region fallthrough
CT: control target
= control target key end

     0   :  { %7 = vsyncpa [#allocation3], 0  ;;  %s645_s0 = inlined_call_operand.hbm [shape: f32[24,384], index: 0, kind: input, shape index: {}]   ;;  %s646_s1 = inlined_call_operand.vmem [shape: s32[24,1], index: 1, kind: input, shape index: {}]   ;;  %s647_s2 = inlined_call_operand.hbm [shape: f32[3,8,128], index: 2, kind: output, shape index: {}]  }
   0x1   :  { %9 = vsyncpa [#allocation3 + $0x1], 0 }
   0x2   :  { %10 = vsyncpa [#allocation4], 0 }
   0x3   :  { %12 = vsyncpa [#allocation4 + $0x1], 0  ;;  %s524_s9 = smov 0   ;;  %s526_s10 = smov 0  }
   0x4   :  { %s528_s11 = smov 0   ;;  %s530_s12 = smov 0  }
   0x5 LB: > { %s545_s13 = sadd.s32 4294967295, %s506_s12   ;;  %s339_s14 = sadd.s32 4294967294, %s506_s12   ;;  %s506_s12 = sphi %s530_s12, %s655_s12   ;;  %s502_s11 = sphi %s528_s11, %s654_s11   ;;  %s498_s10 = sphi %s526_s10, %s653_s10   ;;  %s494_s9 = sphi %s524_s9, %s652_s9  }
   0x6   : > { %s549_s15 = sadd.s32 1, %s506_s12   ;;  %s25_s16 = sadd.s32 1, %s502_s11 }
   0x7   : > { %s22_s17 = ssub.s32 %s506_s12, %s549_s15  ;;  %p32_p0 = scmp.ne.s32.totalorder %s502_s11, %s498_s10 }
   0x8   : > { %p23_p1 = scmp.eq.s32.totalorder %s22_s17, 0  ;;  %p33_p2 = scmp.eq.s32.totalorder %s506_s12, 0 }
   0x9   : > { %p38_p3 = scmp.ne.s32.totalorder %s498_s10, %s494_s9  ;;  %p39_p4 = scmp.eq.s32.totalorder %s545_s13, 0 }
   0xa   : > { %s561_s18 = scalar_select %p23_p1, %s502_s11, %s25_s16  }
   0xb   : > { %p34_p5 = por %p33_p2, %p32_p0  ;;  %p563_p6 = por %p39_p4, %p38_p3 }
   0xc   : > { %p88_p7 = scmp.eq.s32.totalorder %s545_s13, 2  ;;  %p94_p8 = scmp.eq.s32.totalorder %s339_s14, 2 }
   0xd   : > { %p366_p9 = scmp.lt.s32.totalorder %s506_s12, 3  ;;  %s114_s22 = sand.u32 1, %s502_s11  }
   0xe   : > { %p569_p10 = por %p88_p7, %p32_p0  ;;  %p573_p11 = por %p94_p8, %p38_p3 }
   0xf   : > { %s352_s23 = smul.u32 24, %s506_s12  ;;  %p582_p12 = pnand %p366_p9, %p34_p5 }
  0x10   : > { %s351_s24 = smul.u32 24, %s114_s22  ;;  %s115_s4 = scalar_lea.sflag [#allocation3], %s114_s22 }
  0x11   : > { %s123_s27 = scalar_lea.hbm %s645_s0, %s352_s23  ;;  %p414_p0 = pneg %p582_p12 }
  0x12   : > { %s125_s29 = sshll.u32 %s123_s27, 4  ;;  %s118_s30 = scalar_lea.vmem [#allocation2], %s351_s24  ;;  %s126_s29 = int_to_ptr.hbm [resolvable:$true] %s125_s29 }
  0x13   : > { %s127_s3 = sshll.u32 %s118_s30, 4  ;;  %s410_s5 = sshra.s32 %s126_s29, 4  ;;  %s128_s3 = int_to_ptr.vmem [resolvable:$true] %s127_s3  ;;  %s411_s5 = int_to_ptr.hbm [resolvable:$true] %s410_s5 }
  0x14   : > { %s412_s6 = scalar_lea.hbm %s411_s5, 24  ;;  %s417_s14 = scalar_lea.hbm %s645_s0, 72 }
  0x15   : > { %p413_p13 = scmp.ne.s32.totalorder %s411_s5, %s412_s6  ;;  %p418_p3 = scmp.lt.s32.totalorder %s411_s5, %s645_s0 }
  0x16   : > { %p419_p4 = scmp.lt.s32.totalorder %s417_s14, %s412_s6 }
  0x17   : > { %p415_p1 = pnand %p414_p0, %p413_p13 }
  0x18   : > { %p420_p5 = por %p419_p4, %p418_p3 }
  0x19   : > { %p416_p2 = pneg %p415_p1 }
  0x1b   : > { %p421_p7 = pnand %p420_p5, %p416_p2 }
  0x1d   : > { %424 = shalt.err (!%p421_p7)
}
  0x1e   : > { %361 = dma.hbm_to_vmem [thread:$0]  (!%p582_p12), %s126_s29, 384, %s128_s3, %s115_s4  }
  0x1f   : > { %p343_p8 = scmp.ge.s32.totalorder %s506_s12, 1  ;;  %p139_p9 = scmp.lt.s32.totalorder %s506_s12, 4 }
  0x21   : > { %p140_p13 = pnand %p343_p8, %p139_p9 }
  0x22   : > { %s599_s22 = sand.u32 (!%p140_p13), 1, %s498_s10  }
  0x23   : > { %143 = sbr.rel (%p140_p13) target bundleno = 324 (0x144), region = 28  ;;  %s146_s24 = scalar_lea.sflag (!%p140_p13), [#allocation3], %s599_s22 }
  0x24   : > { %s353_s23 = smul.u32 (!%p140_p13), 24, %s599_s22 }
  0x26   : > { %s149_s25 = scalar_lea.vmem (!%p140_p13), [#allocation2], %s353_s23 }
  0x28   : > { %485 = dma.done.wait (%p563_p6), %s146_s24, 384  }
  0x29   : > { %487 = vsyncadd (%p563_p6), %s146_s24, 4294966912  ;;  %v508_v0 = vmov 0   ;;  %v179_v1 = vld [vmem:[%s149_s25] sm:$0xff]  ;;  %v180_v2 = vld [vmem:[%s149_s25 + $0x8] sm:$0xff]  ;;  %p175_p12 = scmp.lt.s32.totalorder %s545_s13, 2  ;;  %v206_v14 = vlaneseq  ;;  %s346_s19 = sshll.u32 %s545_s13, 3 }
  0x2a   : > { %401 = vset.pattern.permute.xlu0 %v508_v0  ;;  %v181_v3 = vld [vmem:[%s149_s25 + $0x10] sm:$0xff]  ;;  %v183_v4 = vmax.f32 %v179_v1, %v180_v2  ;;  %v230_v33 = vstv %s346_s19  ;;  %s344_s3 = sshll.u32 %s599_s22, 3  ;;  %s252_s5 = scalar_lea.hbm %s647_s2, %s346_s19 }
  0x2b   : > { %s176_s26 = scalar_select %p175_p12, %s545_s13, 2  ;;  %v207_v17 = vand.u32 127, %v206_v14  ;;  %v229_v32 = vshrl.u32 %v206_v14, 7 }
  0x2c   : > { %v184_v5 = vmax.f32 %v183_v4, %v181_v3  ;;  %s174_s6 = scalar_lea.vmem [#allocation5], %s344_s3  ;;  %s256_s8 = sshll.u32 %s252_s5, 4  ;;  %s257_s8 = int_to_ptr.hbm [resolvable:$true] %s256_s8 }
  0x2d   : > { %s345_s27 = sshll.u32 %s176_s26, 3  ;;  %v208_v21 = vadd.s32 128, %v207_v17  ;;  %v209_v22 = vadd.s32 256, %v207_v17  ;;  %v231_v37 = vadd.s32 %v230_v33, %v229_v32  ;;  %s254_s7 = sshll.u32 %s174_s6, 4  ;;  %s255_s7 = int_to_ptr.vmem [resolvable:$true] %s254_s7 }
  0x2e   : > { %185 = vmax.xlane.f32.xlu0 %v184_v5  ;;  %s178_s30 = scalar_lea.vmem %s646_s1, %s345_s27  ;;  %s242_s14 = scalar_lea.sflag [#allocation4], %s599_s22 }
  0x2f   : > { %v182_v6 = vld [vmem:[%s178_s30] sm:$0xff]  ;;  %vm232_vm3 = vcmp.lt.s32.totalorder %v231_v37, 20  ;;  %s454_s16 = sshra.s32 %s257_s8, 4  ;;  %s460_s25 = scalar_lea.hbm %s647_s2, 24  ;;  %s455_s16 = int_to_ptr.hbm [resolvable:$true] %s454_s16 }
  0x30   : > { %s456_s17 = scalar_lea.hbm %s455_s16, 8  ;;  %p461_p2 = scmp.lt.s32.totalorder %s455_s16, %s647_s2 }
  0x31   : > { %p457_p6 = scmp.ne.s32.totalorder %s455_s16, %s456_s17  ;;  %p462_p3 = scmp.lt.s32.totalorder %s460_s25, %s456_s17 }
  0x33   : > { %p458_p0 = pnand %p457_p6, %p569_p10  ;;  %p463_p4 = por %p462_p3, %p461_p2 }
  0x35   : > { %p459_p1 = pneg %p458_p0 }
  0x37   : > { %p464_p5 = pnand %p463_p4, %p459_p1 }
  0x42   : > { %211 = vperm.xlu0 %401, %v182_v6  }
  0xa1   : > { %v186_v7 = vpop.xlane.xlu0 %185 }
  0xa2   : > { %v187_v8 = vsub.f32 %v179_v1, %v186_v7  ;;  %v188_v9 = vsub.f32 %v180_v2, %v186_v7  ;;  %v189_v10 = vsub.f32 %v181_v3, %v186_v7 }
  0xa4   : > { %v190_v11 = vmul.f32 1.442695, %v187_v8  ;;  %v192_v12 = vmul.f32 1.442695, %v188_v9  ;;  %v194_v13 = vmul.f32 1.442695, %v189_v10  ;;  %v202_v24 = vadd.f32 %v188_v9, %v187_v8 }
  0xa6   : > { %402 = vpow2.f32 %v190_v11  ;;  %v203_v28 = vadd.f32 %v202_v24, %v189_v10 }
  0xa7   : > { %404 = vpow2.f32 %v192_v12 }
  0xa8   : > { %406 = vpow2.f32 %v194_v13 }
  0xac   : > { %v403_v15 = vpop.eup %402 }
  0xad   : > { %v405_v16 = vpop.eup %404 }
  0xae   : > { %v196_v18 = vadd.f32 %v405_v16, %v403_v15  ;;  %v407_v19 = vpop.eup %406 }
  0xb0   : > { %v197_v20 = vadd.f32 %v407_v19, %v196_v18 }
  0xb2   : > { %198 = vadd.xlane.f32.xlu1 %v197_v20 }
  0xb4   : > { %v212_v23 = vpop.permute.xlu0 %211 }
  0xb5   : > { %vm213_vm0 = vcmp.eq.s32.totalorder %v207_v17, %v212_v23  ;;  %vm214_vm1 = vcmp.eq.s32.totalorder %v208_v21, %v212_v23  ;;  %vm215_vm2 = vcmp.eq.s32.totalorder %v209_v22, %v212_v23 }
  0xb6   : > { %v216_v25 = vsel %vm213_vm0, %v187_v8, 0.0  ;;  %v217_v26 = vsel %vm214_vm1, %v188_v9, 0.0  ;;  %v218_v29 = vsel %vm215_vm2, %v189_v10, 0.0 }
  0xb7   : > { %v219_v27 = vadd.f32 %v217_v26, %v216_v25 }
  0xb9   : > { %v220_v30 = vadd.f32 %v219_v27, %v218_v29 }
  0xba   : > { %204 = vadd.xlane.f32.xlu1 %v203_v28 }
  0xbb   : > { %221 = vadd.xlane.f32.xlu2 %v220_v30 }
 0x125   : > { %v199_v31 = vpop.xlane.xlu1 %198 }
 0x126   : > { %408 = vlog2.f32 %v199_v31 }
 0x12c   : > { %v409_v34 = vpop.eup %408 }
 0x12d   : > { %v201_v35 = vmul.f32 0.6931472, %v409_v34  ;;  %v205_v36 = vpop.xlane.xlu1 %204 }
 0x12e   : > { %v223_v38 = vmul.f32 0.00052083336, %v205_v36  ;;  %v222_v39 = vpop.xlane.xlu2 %221 }
 0x12f   : > { %v225_v40 = vmul.f32 0.8, %v222_v39 }
 0x130   : > { %v224_v41 = vsub.f32 %v201_v35, %v223_v38 }
 0x132   : > { %v226_v42 = vsub.f32 %v224_v41, %v225_v40 }
 0x134   : > { %v233_v43 = vsel %vm232_vm3, %v226_v42, 0.0 }
 0x135   : > { %v234_v44 = vrot.slane %v233_v43, 4 }
 0x137   : > { %v235_v45 = vadd.f32 %v234_v44, %v233_v43 }
 0x139   : > { %v236_v46 = vrot.slane %v235_v45, 2 }
 0x13b   : > { %v237_v47 = vadd.f32 %v236_v46, %v235_v45 }
 0x13d   : > { %v238_v48 = vrot.slane %v237_v47, 1 }
 0x13f   : > { %v239_v49 = vadd.f32 %v238_v48, %v237_v47 }
 0x141   : > { %240 = vst [vmem:[%s174_s6] sm:$0xff] %v239_v49 }
 0x142   : > { %467 = shalt.err (!%p464_p5)
}
 0x143   : > { %356 = dma.vmem_to_hbm [thread:$0]  (%p569_p10), %s255_s7, 128, %s257_s8, %s242_s14  }
 0x144 PF: > { %p367_p7 = scmp.ge.s32.totalorder %s506_s12, 2  ;;  %s268_s22 = sand.u32 1, %s494_s9  }
 0x145   : > { %s269_s28 = scalar_lea.sflag [#allocation4], %s268_s22 }
 0x146   : > { %p363_p8 = pnand %p367_p7, %p573_p11 }
 0x148   : > { %p364_p9 = pneg %p363_p8 }
 0x14a   : > { %489 = dma.done.wait (%p364_p9), %s269_s28, 128  }
 0x14b   : > { %491 = vsyncadd (%p364_p9), %s269_s28, 4294967168  ;;  %p15_p13 = scmp.ge.s32.totalorder %s549_s15, 5   ;;  %s652_s9 = smov %s498_s10 }
 0x14c   : > { %s653_s10 = smov %s502_s11  ;;  %s654_s11 = smov %s561_s18 }
 0x14d   : > { %s655_s12 = smov %s549_s15  ;;  %17 = sbr.rel (!%p15_p13) target bundleno = 5 (0x5), region = 76 }
 0x152   :  { %275 = vsyncpa [#allocation3], 1 }
 0x153   :  { %277 = vsyncpa [#allocation3 + $0x1], 1 }
 0x154   :  { %278 = vsyncpa [#allocation4], 1 }
 0x155   :  { %280 = vsyncpa [#allocation4 + $0x1], 1 }

</bundles_post_ra>
